<compile_context>
chip_gen: v5e
topology: v5e:2x2
jax: 0.10.0
libtpu: 0.0.40
codegen_flags: <defaults>
</compile_context>

<pallas_src>
import math
from functools import partial

import jax
import jax.numpy as jnp
from jax.experimental import pallas as pl
from jax.experimental.pallas import tpu as pltpu

_VMEM_LIMIT = 32 * 1024 * 1024  # safe scoped limit on v5e/v6e/v7x for these tile sizes


# ----------------------------------------------------------------------------
# Pallas kernel 1: tiled fused linear projection  y = x @ W + b
# ----------------------------------------------------------------------------
def _linear_kernel(x_ref, w_ref, b_ref, o_ref):
    # Weight arrives pre-cast to bf16 (no per-step convert); activation cast
    # in-kernel; f32 accumulation and bias-add.
    x = x_ref[...].astype(jnp.bfloat16)
    acc = jnp.dot(x, w_ref[...], preferred_element_type=jnp.float32)
    o_ref[...] = (acc + b_ref[...]).astype(o_ref.dtype)


def _pick_tm(M, target):
    """Row-tile: full extent when small, else a sublane-aligned divisor of M."""
    if M <= target:
        return M
    cap = max(8, (target // 8) * 8)
    for tm in range(cap, 7, -8):
        if M % tm == 0:
            return tm            # exact divisor: no dead padded-row MXU work
    return cap                   # fall back to cdiv-padded trailing tile


def linear_pallas(x2d, w, b, *, tm=512):
    """x2d: (M, K) f32, w: (K, N) f32|bf16, b: (N,) f32 -> (M, N) f32."""
    M, K = x2d.shape
    K2, N = w.shape
    assert K == K2
    w_bf = w if w.dtype == jnp.bfloat16 else w.astype(jnp.bfloat16)
    b2d = b.reshape(1, N).astype(jnp.float32)

    tm_eff = _pick_tm(M, tm)
    grid_m = pl.cdiv(M, tm_eff)

    # TODO(synk): for small d_model (N < 128) the output store is lane-masked;
    # real Autoformer sizes (d_model >= 512) are already lane-dense so we do not
    # pad/slice here.
    cost = pl.CostEstimate(
        flops=2 * M * K * N,
        transcendentals=0,
        bytes_accessed=4 * M * K + 2 * K * N + 4 * M * N + 4 * N,
    )
    return pl.pallas_call(
        _linear_kernel,
        out_shape=jax.ShapeDtypeStruct((M, N), x2d.dtype),
        grid=(grid_m,),
        in_specs=[
            pl.BlockSpec((tm_eff, K), lambda i: (i, 0)),  # activation tile (pipelined)
            pl.BlockSpec((K, N), lambda i: (0, 0)),       # bf16 weight, resident
            pl.BlockSpec((1, N), lambda i: (0, 0)),       # bias, resident
        ],
        out_specs=pl.BlockSpec((tm_eff, N), lambda i: (i, 0)),
        compiler_params=pltpu.CompilerParams(
            dimension_semantics=("parallel",),
            vmem_limit_bytes=_VMEM_LIMIT,
        ),
        cost_estimate=cost,
    )(x2d, w_bf, b2d)


def _linear_ref(x2d, w, b):
    return x2d @ w + b


# ----------------------------------------------------------------------------
# Pallas kernel 2: time-delay aggregation (inference/eval variant)
#   out[b, t, c] = sum_i weights[b, i] * values[b, (t + delay[b, i]) % L, c]
# Channels-on-lanes layout: values (B, L, C).  Per (batch, channel-tile) the
# kernel stages the (L, tc) values twice into a (2L, tc) VMEM scratch and
# accumulates top_k dynamically pl.ds-sliced views (O(top_k * L * tc) work,
# no MXU, no O(L^2) live values).
# ----------------------------------------------------------------------------
def _time_delay_agg_kernel(delay_ref, weight_ref, v_ref, o_ref, vv_ref,
                           *, top_k, length):
    b = pl.program_id(0)
    base = b * top_k
    v = v_ref[0].astype(jnp.float32)                 # (L, tc)
    # Stage values twice so one dynamic slice covers the (t + d) % L wrap.
    vv_ref[pl.ds(0, length), :] = v
    vv_ref[pl.ds(length, length), :] = v

    def take(i):
        # Cheap scalar guard: keep the dynamic start strictly inside [0, L)
        # (VMEM reads have no runtime bounds check).
        d = jax.lax.rem(delay_ref[base + i], jnp.int32(length))
        return weight_ref[base + i] * vv_ref[pl.ds(d, length), :]

    acc = take(0)
    for i in range(1, top_k):     # static unroll: top_k = factor * log(L), small
        acc = acc + take(i)
    o_ref[0] = acc.astype(o_ref.dtype)


def _pick_channel_tile(C):
    """Full-extent block when C is small / not lane-aligned; otherwise a
    128-multiple divisor so v7x megacore gets extra parallel grid steps."""
    if C <= 256 or C % 128 != 0:
        return C
    for tc in (512, 256, 128):
        if C % tc == 0:
            return tc
    return C


def time_delay_agg_pallas(values_blc, delay, weights):
    """values_blc: (B, L, C) f32, delay: (B, K) int32, weights: (B, K) f32."""
    B, L, C = values_blc.shape
    top_k = delay.shape[1]
    tc = _pick_channel_tile(C)
    n_c = C // tc

    # Flatten scalar-prefetch operands to 1-D to avoid 2-D SMEM (8,128) padding.
    delay_flat = delay.reshape(-1).astype(jnp.int32)
    weight_flat = weights.reshape(-1).astype(jnp.float32)

    kernel = partial(_time_delay_agg_kernel, top_k=top_k, length=L)
    grid_spec = pltpu.PrefetchScalarGridSpec(
        num_scalar_prefetch=2,
        grid=(B, n_c),
        in_specs=[pl.BlockSpec((1, L, tc), lambda b, c, d, w: (b, 0, c))],
        out_specs=pl.BlockSpec((1, L, tc), lambda b, c, d, w: (b, 0, c)),
        scratch_shapes=[pltpu.VMEM((2 * L, tc), jnp.float32)],
    )
    cost = pl.CostEstimate(
        flops=2 * B * top_k * L * C,
        transcendentals=0,
        bytes_accessed=4 * (2 * B * L * C + 2 * B * top_k),
    )
    return pl.pallas_call(
        kernel,
        grid_spec=grid_spec,
        out_shape=jax.ShapeDtypeStruct((B, L, C), values_blc.dtype),
        compiler_params=pltpu.CompilerParams(
            dimension_semantics=("parallel", "parallel"),
            vmem_limit_bytes=_VMEM_LIMIT,
        ),
        cost_estimate=cost,
    )(delay_flat, weight_flat, values_blc)


def _time_delay_agg_ref(values_blc, delay, weights):
    B, L, C = values_blc.shape
    out = jnp.zeros_like(values_blc)
    for i in range(delay.shape[1]):
        idx = (jnp.arange(L)[None, :] + delay[:, i:i + 1]) % L  # (B, L)
        pattern = jnp.take_along_axis(
            values_blc, jnp.broadcast_to(idx[:, :, None], (B, L, C)), axis=1)
        out = out + pattern * weights[:, i][:, None, None]
    return out


# ----------------------------------------------------------------------------
# Inner correlation (Autoformer AutoCorrelation, eval mode)
# ----------------------------------------------------------------------------
def _auto_correlation(queries, keys, values, factor, agg_fn, output_attention=False):
    # queries: (B, L, H, E); keys/values: (B, S, H, E/D)
    B, L, H, E = queries.shape
    _, S, _, D = values.shape
    if L > S:
        values = jnp.concatenate(
            [values, jnp.zeros((B, L - S, H, D), values.dtype)], axis=1)
        keys = jnp.concatenate(
            [keys, jnp.zeros((B, L - S, H, E), keys.dtype)], axis=1)
    else:
        values = values[:, :L]
        keys = keys[:, :L]

    # TODO(synk): rfft/irfft (period-based correlation) has no clean Pallas TPU
    # equivalent; kept as plain-JAX glue.
    q_t = jnp.transpose(queries, (0, 2, 3, 1))  # (B, H, E, L) for FFT over time
    k_t = jnp.transpose(keys, (0, 2, 3, 1))
    q_fft = jnp.fft.rfft(q_t, axis=-1)
    k_fft = jnp.fft.rfft(k_t, axis=-1)
    corr = jnp.fft.irfft(q_fft * jnp.conj(k_fft), n=L, axis=-1)  # (B, H, E, L)

    # top-k delay selection (glue; sorting/top-k has no clean Pallas equivalent)
    top_k = int(factor * math.log(L))
    mean_value = jnp.mean(corr, axis=(1, 2))                # (B, L)
    weights, delay = jax.lax.top_k(mean_value, top_k)       # (B, top_k)
    tmp_corr = jax.nn.softmax(weights, axis=-1)

    # Channels-on-lanes aggregation: no transposes, output already (B, L, H*D).
    v_blc = values.reshape(B, L, H * D).astype(jnp.float32)
    agg = agg_fn(v_blc, delay.astype(jnp.int32), tmp_corr.astype(jnp.float32))
    V = agg.reshape(B, L, H, D)
    attn = jnp.transpose(corr, (0, 3, 1, 2)) if output_attention else None
    return V, attn


# ----------------------------------------------------------------------------
# AutoCorrelationLayer
# ----------------------------------------------------------------------------
class AutoCorrelationLayerPallas:
    # TODO(synk): MonarchProjection path (use_monarch=True) not implemented;
    # standard nn.Linear projections (use_monarch=False) are assumed.
    def __init__(self, d_model, n_heads, key, d_keys=None, d_values=None, factor=1):
        d_keys = d_keys or d_model // n_heads
        d_values = d_values or d_model // n_heads
        self.n_heads = n_heads
        self.factor = factor

        ks = jax.random.split(key, 8)

        def init_linear(kw, kb, fan_in, fan_out):
            bound = 1.0 / math.sqrt(fan_in)
            w = jax.random.uniform(kw, (fan_in, fan_out), jnp.float32, -bound, bound)
            b = jax.random.uniform(kb, (fan_out,), jnp.float32, -bound, bound)
            return w, b

        self.wq, self.bq = init_linear(ks[0], ks[1], d_model, d_keys * n_heads)
        self.wk, self.bk = init_linear(ks[2], ks[3], d_model, d_keys * n_heads)
        self.wv, self.bv = init_linear(ks[4], ks[5], d_model, d_values * n_heads)
        self.wo, self.bo = init_linear(ks[6], ks[7], d_values * n_heads, d_model)

        # Pre-fused weights for shared-input (self/cross attention) projections.
        self.w_qkv = jnp.concatenate([self.wq, self.wk, self.wv], axis=1)
        self.b_qkv = jnp.concatenate([self.bq, self.bk, self.bv])
        self.w_kv = jnp.concatenate([self.wk, self.wv], axis=1)
        self.b_kv = jnp.concatenate([self.bk, self.bv])

        # f32 weights for the reference path; bf16 weights pre-cast ONCE for the
        # Pallas path (half the weight HBM->VMEM DMA, no per-step convert).
        self.f32 = {"wq": self.wq, "wk": self.wk, "wv": self.wv, "wo": self.wo,
                    "w_qkv": self.w_qkv, "w_kv": self.w_kv}
        self.mxu = {k: v.astype(jnp.bfloat16) for k, v in self.f32.items()}

    # --- projections (fused when inputs are literally shared tensors) ---------
    def _project(self, queries, keys, values, linear_fn, W):
        B, L, _ = queries.shape
        _, S, _ = keys.shape
        H = self.n_heads
        nq, nk = self.wq.shape[1], self.wk.shape[1]
        q2d = queries.reshape(B * L, -1)
        k2d = keys.reshape(B * S, -1)
        v2d = values.reshape(B * S, -1)
        if (queries is keys) and (keys is values):
            qkv = linear_fn(q2d, W["w_qkv"], self.b_qkv)
            q, k, v = qkv[:, :nq], qkv[:, nq:nq + nk], qkv[:, nq + nk:]
        elif keys is values:
            q = linear_fn(q2d, W["wq"], self.bq)
            kv = linear_fn(k2d, W["w_kv"], self.b_kv)
            k, v = kv[:, :nk], kv[:, nk:]
        else:
            q = linear_fn(q2d, W["wq"], self.bq)
            k = linear_fn(k2d, W["wk"], self.bk)
            v = linear_fn(v2d, W["wv"], self.bv)
        return (q.reshape(B, L, H, -1),
                k.reshape(B, S, H, -1),
                v.reshape(B, S, H, -1))

    def _correlate_and_project(self, q, k, v, linear_fn, agg_fn, W):
        B, L = q.shape[0], q.shape[1]
        out, attn = _auto_correlation(q, k, v, self.factor, agg_fn)
        out2d = out.reshape(B * L, -1)
        out = linear_fn(out2d, W["wo"], self.bo).reshape(B, L, -1)
        return out, attn

    def _forward(self, queries, keys, values, linear_fn, agg_fn, W):
        q, k, v = self._project(queries, keys, values, linear_fn, W)
        return self._correlate_and_project(q, k, v, linear_fn, agg_fn, W)

    def __call__(self, queries, keys, values, attn_mask=None):
        return self._forward(queries, keys, values,
                             linear_pallas, time_delay_agg_pallas, self.mxu)

    def reference(self, queries, keys, values, attn_mask=None):
        return self._forward(queries, keys, values,
                             _linear_ref, _time_delay_agg_ref, self.f32)


# ----------------------------------------------------------------------------
# Demo + correctness checks
# ----------------------------------------------------------------------------
if __name__ == "__main__":
    B, L, S, d_model, n_heads = 4, 96, 96, 64, 4

    key = jax.random.PRNGKey(0)
    k1, k2, k3, kp, kvt, kdl = jax.random.split(key, 6)
    queries = jax.random.normal(k1, (B, L, d_model), jnp.float32)
    keys_in = jax.random.normal(k2, (B, S, d_model), jnp.float32)
    values_in = jax.random.normal(k3, (B, S, d_model), jnp.float32)

    layer = AutoCorrelationLayerPallas(d_model, n_heads, kp, factor=1)

    # --- unit check: tiled linear kernel (bf16 MXU, f32 accumulate) ----------
    x2d = queries.reshape(B * L, d_model)
    y = jax.block_until_ready(linear_pallas(x2d, layer.wq, layer.bq))
    y_ref = _linear_ref(x2d, layer.wq, layer.bq)
    assert jnp.allclose(y, y_ref, atol=2e-2, rtol=2e-2), "linear kernel mismatch"

    # --- unit check: time-delay aggregation kernel ---------------------------
    C = d_model  # H * d_values
    top_k = int(layer.factor * math.log(L))
    v_test = jax.random.normal(kvt, (B, L, C), jnp.float32)
    delay_t = jax.random.randint(kdl, (B, top_k), 0, L, jnp.int32)
    w_test = jax.nn.softmax(jax.random.normal(kdl, (B, top_k), jnp.float32), axis=-1)
    agg = jax.block_until_ready(time_delay_agg_pallas(v_test, delay_t, w_test))
    agg_ref = _time_delay_agg_ref(v_test, delay_t, w_test)
    assert jnp.allclose(agg, agg_ref, atol=1e-3, rtol=1e-3), "agg kernel mismatch"

    # --- end-to-end forward (distinct q/k/v inputs; separate projections) ----
    out, attn = layer(queries, keys_in, values_in, None)
    out = jax.block_until_ready(out)
    assert out.shape == (B, L, d_model)
    # Reference downstream sharing the (Pallas) projections so the top-k delay
    # selection is identical between both paths (avoids tie-break flakiness).
    q_p, k_p, v_p = layer._project(queries, keys_in, values_in,
                                   linear_pallas, layer.mxu)
    out_ref, _ = layer._correlate_and_project(
        q_p, k_p, v_p, _linear_ref, _time_delay_agg_ref, layer.f32)
    assert jnp.allclose(out, out_ref, atol=2e-2, rtol=2e-2), "forward mismatch"

    # --- end-to-end forward (self-attention; fused QKV projection path) ------
    out_sa, _ = layer(queries, queries, queries, None)
    out_sa = jax.block_until_ready(out_sa)
    assert out_sa.shape == (B, L, d_model)
    q_s, k_s, v_s = layer._project(queries, queries, queries,
                                   linear_pallas, layer.mxu)
    out_sa_ref, _ = layer._correlate_and_project(
        q_s, k_s, v_s, _linear_ref, _time_delay_agg_ref, layer.f32)
    assert jnp.allclose(out_sa, out_sa_ref, atol=2e-2, rtol=2e-2), "fused-path mismatch"

    print("KERNEL_OK")
</pallas_src>

<mosaic_0001>
module attributes {stable_mosaic.version = 11 : i64} {
  func.func @_linear_kernel(%arg0: i32, %arg1: memref<384x64xf32, #tpu.memory_space<vmem>>, %arg2: memref<64x64xbf16, #tpu.memory_space<vmem>>, %arg3: memref<1x64xf32, #tpu.memory_space<vmem>>, %arg4: memref<384x64xf32, #tpu.memory_space<vmem>>) attributes {dimension_semantics = [#tpu.dimension_semantics<parallel>], iteration_bounds = array<i64: 1>, scalar_prefetch = 0 : i64, scratch_operands = 0 : i64, tpu.core_type = #tpu.core_type<tc>, window_params = [{transform_indices = @transform_0, window_bounds = array<i64: 384, 64>}, {pipeline_mode = #tpu.pipeline_mode<synchronous>, transform_indices = @transform_1, window_bounds = array<i64: 64, 64>}, {pipeline_mode = #tpu.pipeline_mode<synchronous>, transform_indices = @transform_2, window_bounds = array<i64: 1, 64>}, {transform_indices = @transform_3, window_bounds = array<i64: 384, 64>}]} {
    %c0 = arith.constant 0 : index
    %c0_0 = arith.constant 0 : index
    %0 = vector.load %arg1[%c0, %c0_0] : memref<384x64xf32, #tpu.memory_space<vmem>>, vector<384x64xf32>
    %1 = arith.truncf %0 : vector<384x64xf32> to vector<384x64xbf16>
    %c0_1 = arith.constant 0 : index
    %c0_2 = arith.constant 0 : index
    %2 = vector.load %arg2[%c0_1, %c0_2] : memref<64x64xbf16, #tpu.memory_space<vmem>>, vector<64x64xbf16>
    %cst = arith.constant dense<0.000000e+00> : vector<384x64xf32>
    %3 = tpu.matmul %1, %2, %cst {dimension_numbers = #tpu.dot_dimension_numbers<[1], [0], [0], [1], [0, 0, 1, 1], [], []>} : vector<384x64xbf16>, vector<64x64xbf16>, vector<384x64xf32> -> vector<384x64xf32>
    %c0_3 = arith.constant 0 : index
    %c0_4 = arith.constant 0 : index
    %4 = vector.load %arg3[%c0_3, %c0_4] : memref<1x64xf32, #tpu.memory_space<vmem>>, vector<1x64xf32>
    %5 = vector.broadcast %4 : vector<1x64xf32> to vector<384x64xf32>
    %6 = arith.addf %3, %5 : vector<384x64xf32>
    %c0_5 = arith.constant 0 : index
    %c0_6 = arith.constant 0 : index
    %7 = vector.load %arg4[%c0_5, %c0_6] : memref<384x64xf32, #tpu.memory_space<vmem>>, vector<384x64xf32>
    tpu.vector_store %arg4[%c0_5, %c0_6], %6 {strides = array<i32>} : memref<384x64xf32, #tpu.memory_space<vmem>>, vector<384x64xf32>,
    return
  }
  func.func @transform_0(%arg0: i32) -> (i32, i32) {
    %c0_i32 = arith.constant 0 : i32
    %c0_i32_0 = arith.constant 0 : i32
    return %arg0, %c0_i32 : i32, i32
  }
  func.func @transform_1(%arg0: i32) -> (i32, i32) {
    %c0_i32 = arith.constant 0 : i32
    %c0_i32_0 = arith.constant 0 : i32
    %c0_i32_1 = arith.constant 0 : i32
    return %c0_i32, %c0_i32_0 : i32, i32
  }
  func.func @transform_2(%arg0: i32) -> (i32, i32) {
    %c0_i32 = arith.constant 0 : i32
    %c0_i32_0 = arith.constant 0 : i32
    %c0_i32_1 = arith.constant 0 : i32
    return %c0_i32, %c0_i32_0 : i32, i32
  }
  func.func @transform_3(%arg0: i32) -> (i32, i32) {
    %c0_i32 = arith.constant 0 : i32
    %c0_i32_0 = arith.constant 0 : i32
    return %arg0, %c0_i32 : i32, i32
  }
}

</mosaic_0001>

<bundles_post_ra>
// kernel: tpu_custom_call.1
= control target key start
LH: loop header
LB: loop body
LE: loop exit
PB: predicated region body
PF: predicated region fallthrough
CT: control target
= control target key end

     0   :  { %vm123_vm0 = vcmask 523264   ;;  %s879_s1 = inlined_call_operand.vmem [shape: bf16[64,64], index: 1, kind: input, shape index: {}]   ;;  %s880_s0 = inlined_call_operand.vmem [shape: f32[384,64], index: 0, kind: input, shape index: {}]   ;;  %s881_s2 = inlined_call_operand.vmem [shape: f32[1,64], index: 2, kind: input, shape index: {}]   ;;  %s882_s3 = inlined_call_operand.vmem [shape: f32[384,64], index: 3, kind: output, shape index: {}]  }
   0x1   :  { %v420_v0 = vld [vmem:[%s879_s1 + $0x18] sm:$0xff]  ;;  %v419_v1 = vld [vmem:[%s879_s1 + $0x10] sm:$0xff]  ;;  %v418_v2 = vld [vmem:[%s879_s1 + $0x8] sm:$0xff] }
   0x2   :  { %200 = vmatpush.bf16.msra.mxu0 %v420_v0  ;;  %421 = vmatpush.bf16.msra.mxu1 %v420_v0  ;;  %v417_v3 = vld [vmem:[%s879_s1] sm:$0xff]  ;;  %v16_v5 = vld [vmem:[%s880_s0 + $0x8] sm:$0xff]  ;;  %v17_v16 = vld [vmem:[%s880_s0 + $0x10] sm:$0xff] }
   0x3   :  { %422 = vmatpush.bf16.msra.mxu2 %v420_v0  ;;  %423 = vmatpush.bf16.msra.mxu3 %v420_v0  ;;  %v15_v4 = vld [vmem:[%s880_s0] sm:$0xff]  ;;  %v28_v7 = vld [vmem:[%s880_s0 + $0x68] sm:$0xff]  ;;  %v18_v17 = vld [vmem:[%s880_s0 + $0x18] sm:$0xff] }
   0x4   :  { %v27_v6 = vld [vmem:[%s880_s0 + $0x60] sm:$0xff]  ;;  %v40_v9 = vld [vmem:[%s880_s0 + $0xc8] sm:$0xff]  ;;  %v63_v12 = vpack.c.bf16 %v16_v5, %v15_v4  ;;  %v29_v18 = vld [vmem:[%s880_s0 + $0x70] sm:$0xff]  ;;  %v64_v24 = vpack.c.bf16 %v18_v17, %v17_v16 }
   0x5   :  { %v39_v8 = vld [vmem:[%s880_s0 + $0xc0] sm:$0xff]  ;;  %v52_v11 = vld [vmem:[%s880_s0 + $0x128] sm:$0xff]  ;;  %v69_v13 = vpack.c.bf16 %v28_v7, %v27_v6  ;;  %v30_v19 = vld [vmem:[%s880_s0 + $0x78] sm:$0xff] }
   0x6   :  { %201 = vmatpush.bf16.msra.mxu0 %v419_v1  ;;  %424 = vmatpush.bf16.msra.mxu1 %v419_v1  ;;  %v51_v10 = vld [vmem:[%s880_s0 + $0x120] sm:$0xff]  ;;  %v75_v14 = vpack.c.bf16 %v40_v9, %v39_v8  ;;  %v41_v20 = vld [vmem:[%s880_s0 + $0xd0] sm:$0xff]  ;;  %v42_v21 = vld [vmem:[%s880_s0 + $0xd8] sm:$0xff]  ;;  %v70_v25 = vpack.c.bf16 %v30_v19, %v29_v18 }
   0x7   :  { %425 = vmatpush.bf16.msra.mxu2 %v419_v1  ;;  %426 = vmatpush.bf16.msra.mxu3 %v419_v1  ;;  %v81_v15 = vpack.c.bf16 %v52_v11, %v51_v10  ;;  %v53_v22 = vld [vmem:[%s880_s0 + $0x130] sm:$0xff]  ;;  %v54_v23 = vld [vmem:[%s880_s0 + $0x138] sm:$0xff]  ;;  %v76_v26 = vpack.c.bf16 %v42_v21, %v41_v20  ;;  %v19_v28 = vld [vmem:[%s880_s0 + $0x20] sm:$0xff] }
   0x8   :  { %v82_v27 = vpack.c.bf16 %v54_v23, %v53_v22  ;;  %v20_v29 = vld [vmem:[%s880_s0 + $0x28] sm:$0xff]  ;;  %v31_v30 = vld [vmem:[%s880_s0 + $0x80] sm:$0xff]  ;;  %v21_v40 = vld [vmem:[%s880_s0 + $0x30] sm:$0xff] }
   0x9   :  { %v32_v31 = vld [vmem:[%s880_s0 + $0x88] sm:$0xff]  ;;  %v43_v32 = vld [vmem:[%s880_s0 + $0xe0] sm:$0xff]  ;;  %v65_v36 = vpack.c.bf16 %v20_v29, %v19_v28  ;;  %v22_v41 = vld [vmem:[%s880_s0 + $0x38] sm:$0xff] }
   0xa   :  { %202 = vmatpush.bf16.msra.mxu0 %v418_v2  ;;  %427 = vmatpush.bf16.msra.mxu1 %v418_v2  ;;  %v44_v33 = vld [vmem:[%s880_s0 + $0xe8] sm:$0xff]  ;;  %v55_v34 = vld [vmem:[%s880_s0 + $0x140] sm:$0xff]  ;;  %v71_v37 = vpack.c.bf16 %v32_v31, %v31_v30  ;;  %v33_v42 = vld [vmem:[%s880_s0 + $0x90] sm:$0xff]  ;;  %v66_v48 = vpack.c.bf16 %v22_v41, %v21_v40 }
   0xb   :  { %428 = vmatpush.bf16.msra.mxu2 %v418_v2  ;;  %429 = vmatpush.bf16.msra.mxu3 %v418_v2  ;;  %v56_v35 = vld [vmem:[%s880_s0 + $0x148] sm:$0xff]  ;;  %v77_v38 = vpack.c.bf16 %v44_v33, %v43_v32  ;;  %v34_v43 = vld [vmem:[%s880_s0 + $0x98] sm:$0xff]  ;;  %v45_v44 = vld [vmem:[%s880_s0 + $0xf0] sm:$0xff] }
   0xc   :  { %v83_v39 = vpack.c.bf16 %v56_v35, %v55_v34  ;;  %v46_v45 = vld [vmem:[%s880_s0 + $0xf8] sm:$0xff]  ;;  %v57_v46 = vld [vmem:[%s880_s0 + $0x150] sm:$0xff]  ;;  %v72_v49 = vpack.c.bf16 %v34_v43, %v33_v42  ;;  %v23_v52 = vld [vmem:[%s880_s0 + $0x40] sm:$0xff] }
   0xd   :  { %v58_v47 = vld [vmem:[%s880_s0 + $0x158] sm:$0xff]  ;;  %v78_v50 = vpack.c.bf16 %v46_v45, %v45_v44  ;;  %v24_v53 = vld [vmem:[%s880_s0 + $0x48] sm:$0xff]  ;;  %v35_v54 = vld [vmem:[%s880_s0 + $0xa0] sm:$0xff] }
   0xe   :  { %203 = vmatpush.bf16.msra.mxu0 %v417_v3  ;;  %430 = vmatpush.bf16.msra.mxu1 %v417_v3  ;;  %v84_v51 = vpack.c.bf16 %v58_v47, %v57_v46  ;;  %v36_v55 = vld [vmem:[%s880_s0 + $0xa8] sm:$0xff]  ;;  %v47_v56 = vld [vmem:[%s880_s0 + $0x100] sm:$0xff]  ;;  %v67_v60 = vpack.c.bf16 %v24_v53, %v23_v52  ;;  %v25_v0 = vld [vmem:[%s880_s0 + $0x50] sm:$0xff] }
   0xf   :  { %431 = vmatpush.bf16.msra.mxu2 %v417_v3  ;;  %432 = vmatpush.bf16.msra.mxu3 %v417_v3  ;;  %v48_v57 = vld [vmem:[%s880_s0 + $0x108] sm:$0xff]  ;;  %v59_v58 = vld [vmem:[%s880_s0 + $0x160] sm:$0xff]  ;;  %v73_v61 = vpack.c.bf16 %v36_v55, %v35_v54  ;;  %v26_v1 = vld [vmem:[%s880_s0 + $0x58] sm:$0xff] }
  0x10   :  { %v60_v59 = vld [vmem:[%s880_s0 + $0x168] sm:$0xff]  ;;  %v79_v62 = vpack.c.bf16 %v48_v57, %v47_v56  ;;  %v37_v2 = vld [vmem:[%s880_s0 + $0xb0] sm:$0xff]  ;;  %v38_v3 = vld [vmem:[%s880_s0 + $0xb8] sm:$0xff]  ;;  %v68_v8 = vpack.c.bf16 %v26_v1, %v25_v0 }
  0x11   :  { %393 = vmatmul.msk.bf16.vlgmr.msra.gmra.mxu0 %vm123_vm0, %v63_v12  ;;  %399 = vmatmul.msk.bf16.vlgmr.msra.gmra.mxu1 %vm123_vm0, %v69_v13  ;;  %v85_v63 = vpack.c.bf16 %v60_v59, %v59_v58  ;;  %v49_v4 = vld [vmem:[%s880_s0 + $0x110] sm:$0xff]  ;;  %v50_v5 = vld [vmem:[%s880_s0 + $0x118] sm:$0xff]  ;;  %v74_v9 = vpack.c.bf16 %v38_v3, %v37_v2  ;;  %v637_v12 = vld [vmem:[%s881_s2] ss:$0 sm:$0xff] }
  0x12   :  { %405 = vmatmul.msk.bf16.vlgmr.msra.gmra.mxu2 %vm123_vm0, %v75_v14  ;;  %411 = vmatmul.msk.bf16.vlgmr.msra.gmra.mxu3 %vm123_vm0, %v81_v15  ;;  %v61_v6 = vld [vmem:[%s880_s0 + $0x170] sm:$0xff]  ;;  %v62_v7 = vld [vmem:[%s880_s0 + $0x178] sm:$0xff]  ;;  %v80_v10 = vpack.c.bf16 %v50_v5, %v49_v4 }
  0x13   :  { %v86_v11 = vpack.c.bf16 %v62_v7, %v61_v6 }
  0x21   :  { %394 = vmatmul.msk.bf16.gmra.mxu0 %vm123_vm0, %v64_v24  ;;  %400 = vmatmul.msk.bf16.gmra.mxu1 %vm123_vm0, %v70_v25 }
  0x22   :  { %406 = vmatmul.msk.bf16.gmra.mxu2 %vm123_vm0, %v76_v26  ;;  %412 = vmatmul.msk.bf16.gmra.mxu3 %vm123_vm0, %v82_v27 }
  0x31   :  { %395 = vmatmul.msk.bf16.gmra.mxu0 %vm123_vm0, %v65_v36  ;;  %401 = vmatmul.msk.bf16.gmra.mxu1 %vm123_vm0, %v71_v37 }
  0x32   :  { %407 = vmatmul.msk.bf16.gmra.mxu2 %vm123_vm0, %v77_v38  ;;  %413 = vmatmul.msk.bf16.gmra.mxu3 %vm123_vm0, %v83_v39 }
  0x41   :  { %396 = vmatmul.msk.bf16.gmra.mxu0 %vm123_vm0, %v66_v48  ;;  %402 = vmatmul.msk.bf16.gmra.mxu1 %vm123_vm0, %v72_v49 }
  0x42   :  { %408 = vmatmul.msk.bf16.gmra.mxu2 %vm123_vm0, %v78_v50  ;;  %414 = vmatmul.msk.bf16.gmra.mxu3 %vm123_vm0, %v84_v51 }
  0x51   :  { %397 = vmatmul.msk.bf16.gmra.mxu0 %vm123_vm0, %v67_v60  ;;  %403 = vmatmul.msk.bf16.gmra.mxu1 %vm123_vm0, %v73_v61 }
  0x52   :  { %409 = vmatmul.msk.bf16.gmra.mxu2 %vm123_vm0, %v79_v62  ;;  %415 = vmatmul.msk.bf16.gmra.mxu3 %vm123_vm0, %v85_v63 }
  0x61   :  { %398 = vmatmul.msk.bf16.gmra.mxu0 %vm123_vm0, %v68_v8  ;;  %404 = vmatmul.msk.bf16.gmra.mxu1 %vm123_vm0, %v74_v9 }
  0x62   :  { %410 = vmatmul.msk.bf16.gmra.mxu2 %vm123_vm0, %v80_v10  ;;  %416 = vmatmul.msk.bf16.gmra.mxu3 %vm123_vm0, %v86_v11 }
  0x8e   :  { %v205_v13 = vpop.f32.mrf.mxu0  ;;  %v235_v14 = vpop.f32.mrf.mxu1 }
  0x8f   :  { %v206_v15 = vadd.f32 %v637_v12, %v205_v13  ;;  %v236_v16 = vadd.f32 %v637_v12, %v235_v14 }
  0x91   :  { %325 = vst.msk [vmem:[%s882_s3] sm:$0xff] %vm123_vm0, %v206_v15 }
  0x92   :  { %337 = vst.msk [vmem:[%s882_s3 + $0x60] sm:$0xff] %vm123_vm0, %v236_v16 }
  0x95   :  { %v265_v17 = vpop.f32.mrf.mxu2  ;;  %v295_v18 = vpop.f32.mrf.mxu3 }
  0x96   :  { %v266_v19 = vadd.f32 %v637_v12, %v265_v17  ;;  %v296_v20 = vadd.f32 %v637_v12, %v295_v18  ;;  %v207_v21 = vpop.f32.mrf.mxu0  ;;  %v237_v22 = vpop.f32.mrf.mxu1 }
  0x97   :  { %v208_v23 = vadd.f32 %v637_v12, %v207_v21  ;;  %v238_v24 = vadd.f32 %v637_v12, %v237_v22 }
  0x98   :  { %349 = vst.msk [vmem:[%s882_s3 + $0xc0] sm:$0xff] %vm123_vm0, %v266_v19 }
  0x99   :  { %361 = vst.msk [vmem:[%s882_s3 + $0x120] sm:$0xff] %vm123_vm0, %v296_v20 }
  0x9a   :  { %326 = vst.msk [vmem:[%s882_s3 + $0x8] sm:$0xff] %vm123_vm0, %v208_v23 }
  0x9b   :  { %338 = vst.msk [vmem:[%s882_s3 + $0x68] sm:$0xff] %vm123_vm0, %v238_v24 }
  0x9d   :  { %v267_v25 = vpop.f32.mrf.mxu2  ;;  %v297_v26 = vpop.f32.mrf.mxu3 }
  0x9e   :  { %v268_v27 = vadd.f32 %v637_v12, %v267_v25  ;;  %v298_v28 = vadd.f32 %v637_v12, %v297_v26  ;;  %v210_v29 = vpop.f32.mrf.mxu0  ;;  %v240_v30 = vpop.f32.mrf.mxu1 }
  0x9f   :  { %v211_v31 = vadd.f32 %v637_v12, %v210_v29  ;;  %v241_v32 = vadd.f32 %v637_v12, %v240_v30 }
  0xa0   :  { %350 = vst.msk [vmem:[%s882_s3 + $0xc8] sm:$0xff] %vm123_vm0, %v268_v27 }
  0xa1   :  { %362 = vst.msk [vmem:[%s882_s3 + $0x128] sm:$0xff] %vm123_vm0, %v298_v28 }
  0xa2   :  { %327 = vst.msk [vmem:[%s882_s3 + $0x10] sm:$0xff] %vm123_vm0, %v211_v31 }
  0xa3   :  { %339 = vst.msk [vmem:[%s882_s3 + $0x70] sm:$0xff] %vm123_vm0, %v241_v32 }
  0xa5   :  { %v270_v33 = vpop.f32.mrf.mxu2  ;;  %v300_v34 = vpop.f32.mrf.mxu3 }
  0xa6   :  { %v271_v35 = vadd.f32 %v637_v12, %v270_v33  ;;  %v301_v36 = vadd.f32 %v637_v12, %v300_v34  ;;  %v212_v37 = vpop.f32.mrf.mxu0  ;;  %v242_v38 = vpop.f32.mrf.mxu1 }
  0xa7   :  { %v213_v39 = vadd.f32 %v637_v12, %v212_v37  ;;  %v243_v40 = vadd.f32 %v637_v12, %v242_v38 }
  0xa8   :  { %351 = vst.msk [vmem:[%s882_s3 + $0xd0] sm:$0xff] %vm123_vm0, %v271_v35 }
  0xa9   :  { %363 = vst.msk [vmem:[%s882_s3 + $0x130] sm:$0xff] %vm123_vm0, %v301_v36 }
  0xaa   :  { %328 = vst.msk [vmem:[%s882_s3 + $0x18] sm:$0xff] %vm123_vm0, %v213_v39 }
  0xab   :  { %340 = vst.msk [vmem:[%s882_s3 + $0x78] sm:$0xff] %vm123_vm0, %v243_v40 }
  0xad   :  { %v272_v41 = vpop.f32.mrf.mxu2  ;;  %v302_v42 = vpop.f32.mrf.mxu3 }
  0xae   :  { %v273_v43 = vadd.f32 %v637_v12, %v272_v41  ;;  %v303_v44 = vadd.f32 %v637_v12, %v302_v42  ;;  %v215_v45 = vpop.f32.mrf.mxu0  ;;  %v245_v46 = vpop.f32.mrf.mxu1 }
  0xaf   :  { %v216_v47 = vadd.f32 %v637_v12, %v215_v45  ;;  %v246_v48 = vadd.f32 %v637_v12, %v245_v46 }
  0xb0   :  { %352 = vst.msk [vmem:[%s882_s3 + $0xd8] sm:$0xff] %vm123_vm0, %v273_v43 }
  0xb1   :  { %364 = vst.msk [vmem:[%s882_s3 + $0x138] sm:$0xff] %vm123_vm0, %v303_v44 }
  0xb2   :  { %329 = vst.msk [vmem:[%s882_s3 + $0x20] sm:$0xff] %vm123_vm0, %v216_v47 }
  0xb3   :  { %341 = vst.msk [vmem:[%s882_s3 + $0x80] sm:$0xff] %vm123_vm0, %v246_v48 }
  0xb5   :  { %v275_v49 = vpop.f32.mrf.mxu2  ;;  %v305_v50 = vpop.f32.mrf.mxu3 }
  0xb6   :  { %v276_v51 = vadd.f32 %v637_v12, %v275_v49  ;;  %v306_v52 = vadd.f32 %v637_v12, %v305_v50  ;;  %v217_v53 = vpop.f32.mrf.mxu0  ;;  %v247_v54 = vpop.f32.mrf.mxu1 }
  0xb7   :  { %v218_v55 = vadd.f32 %v637_v12, %v217_v53  ;;  %v248_v56 = vadd.f32 %v637_v12, %v247_v54 }
  0xb8   :  { %353 = vst.msk [vmem:[%s882_s3 + $0xe0] sm:$0xff] %vm123_vm0, %v276_v51 }
  0xb9   :  { %365 = vst.msk [vmem:[%s882_s3 + $0x140] sm:$0xff] %vm123_vm0, %v306_v52 }
  0xba   :  { %330 = vst.msk [vmem:[%s882_s3 + $0x28] sm:$0xff] %vm123_vm0, %v218_v55 }
  0xbb   :  { %342 = vst.msk [vmem:[%s882_s3 + $0x88] sm:$0xff] %vm123_vm0, %v248_v56 }
  0xbd   :  { %v277_v57 = vpop.f32.mrf.mxu2  ;;  %v307_v58 = vpop.f32.mrf.mxu3 }
  0xbe   :  { %v278_v59 = vadd.f32 %v637_v12, %v277_v57  ;;  %v308_v60 = vadd.f32 %v637_v12, %v307_v58  ;;  %v220_v61 = vpop.f32.mrf.mxu0  ;;  %v250_v62 = vpop.f32.mrf.mxu1 }
  0xbf   :  { %v221_v63 = vadd.f32 %v637_v12, %v220_v61  ;;  %v251_v0 = vadd.f32 %v637_v12, %v250_v62 }
  0xc0   :  { %354 = vst.msk [vmem:[%s882_s3 + $0xe8] sm:$0xff] %vm123_vm0, %v278_v59 }
  0xc1   :  { %366 = vst.msk [vmem:[%s882_s3 + $0x148] sm:$0xff] %vm123_vm0, %v308_v60 }
  0xc2   :  { %331 = vst.msk [vmem:[%s882_s3 + $0x30] sm:$0xff] %vm123_vm0, %v221_v63 }
  0xc3   :  { %343 = vst.msk [vmem:[%s882_s3 + $0x90] sm:$0xff] %vm123_vm0, %v251_v0 }
  0xc5   :  { %v280_v1 = vpop.f32.mrf.mxu2  ;;  %v310_v2 = vpop.f32.mrf.mxu3 }
  0xc6   :  { %v281_v3 = vadd.f32 %v637_v12, %v280_v1  ;;  %v311_v4 = vadd.f32 %v637_v12, %v310_v2  ;;  %v222_v5 = vpop.f32.mrf.mxu0  ;;  %v252_v6 = vpop.f32.mrf.mxu1 }
  0xc7   :  { %v223_v7 = vadd.f32 %v637_v12, %v222_v5  ;;  %v253_v8 = vadd.f32 %v637_v12, %v252_v6 }
  0xc8   :  { %355 = vst.msk [vmem:[%s882_s3 + $0xf0] sm:$0xff] %vm123_vm0, %v281_v3 }
  0xc9   :  { %367 = vst.msk [vmem:[%s882_s3 + $0x150] sm:$0xff] %vm123_vm0, %v311_v4 }
  0xca   :  { %332 = vst.msk [vmem:[%s882_s3 + $0x38] sm:$0xff] %vm123_vm0, %v223_v7 }
  0xcb   :  { %344 = vst.msk [vmem:[%s882_s3 + $0x98] sm:$0xff] %vm123_vm0, %v253_v8 }
  0xcd   :  { %v282_v9 = vpop.f32.mrf.mxu2  ;;  %v312_v10 = vpop.f32.mrf.mxu3 }
  0xce   :  { %v283_v11 = vadd.f32 %v637_v12, %v282_v9  ;;  %v313_v13 = vadd.f32 %v637_v12, %v312_v10  ;;  %v225_v14 = vpop.f32.mrf.mxu0  ;;  %v255_v15 = vpop.f32.mrf.mxu1 }
  0xcf   :  { %v226_v16 = vadd.f32 %v637_v12, %v225_v14  ;;  %v256_v17 = vadd.f32 %v637_v12, %v255_v15 }
  0xd0   :  { %356 = vst.msk [vmem:[%s882_s3 + $0xf8] sm:$0xff] %vm123_vm0, %v283_v11 }
  0xd1   :  { %368 = vst.msk [vmem:[%s882_s3 + $0x158] sm:$0xff] %vm123_vm0, %v313_v13 }
  0xd2   :  { %333 = vst.msk [vmem:[%s882_s3 + $0x40] sm:$0xff] %vm123_vm0, %v226_v16 }
  0xd3   :  { %345 = vst.msk [vmem:[%s882_s3 + $0xa0] sm:$0xff] %vm123_vm0, %v256_v17 }
  0xd5   :  { %v285_v18 = vpop.f32.mrf.mxu2  ;;  %v315_v19 = vpop.f32.mrf.mxu3 }
  0xd6   :  { %v286_v20 = vadd.f32 %v637_v12, %v285_v18  ;;  %v316_v21 = vadd.f32 %v637_v12, %v315_v19  ;;  %v227_v22 = vpop.f32.mrf.mxu0  ;;  %v257_v23 = vpop.f32.mrf.mxu1 }
  0xd7   :  { %v228_v24 = vadd.f32 %v637_v12, %v227_v22  ;;  %v258_v25 = vadd.f32 %v637_v12, %v257_v23 }
  0xd8   :  { %357 = vst.msk [vmem:[%s882_s3 + $0x100] sm:$0xff] %vm123_vm0, %v286_v20 }
  0xd9   :  { %369 = vst.msk [vmem:[%s882_s3 + $0x160] sm:$0xff] %vm123_vm0, %v316_v21 }
  0xda   :  { %334 = vst.msk [vmem:[%s882_s3 + $0x48] sm:$0xff] %vm123_vm0, %v228_v24 }
  0xdb   :  { %346 = vst.msk [vmem:[%s882_s3 + $0xa8] sm:$0xff] %vm123_vm0, %v258_v25 }
  0xdd   :  { %v287_v26 = vpop.f32.mrf.mxu2  ;;  %v317_v27 = vpop.f32.mrf.mxu3 }
  0xde   :  { %v288_v28 = vadd.f32 %v637_v12, %v287_v26  ;;  %v318_v29 = vadd.f32 %v637_v12, %v317_v27  ;;  %v230_v30 = vpop.f32.mrf.mxu0  ;;  %v260_v31 = vpop.f32.mrf.mxu1 }
  0xdf   :  { %v231_v32 = vadd.f32 %v637_v12, %v230_v30  ;;  %v261_v33 = vadd.f32 %v637_v12, %v260_v31 }
  0xe0   :  { %358 = vst.msk [vmem:[%s882_s3 + $0x108] sm:$0xff] %vm123_vm0, %v288_v28 }
  0xe1   :  { %370 = vst.msk [vmem:[%s882_s3 + $0x168] sm:$0xff] %vm123_vm0, %v318_v29 }
  0xe2   :  { %335 = vst.msk [vmem:[%s882_s3 + $0x50] sm:$0xff] %vm123_vm0, %v231_v32 }
  0xe3   :  { %347 = vst.msk [vmem:[%s882_s3 + $0xb0] sm:$0xff] %vm123_vm0, %v261_v33 }
  0xe5   :  { %v290_v34 = vpop.f32.mrf.mxu2  ;;  %v320_v35 = vpop.f32.mrf.mxu3 }
  0xe6   :  { %v291_v36 = vadd.f32 %v637_v12, %v290_v34  ;;  %v321_v37 = vadd.f32 %v637_v12, %v320_v35  ;;  %v232_v38 = vpop.f32.mrf.mxu0  ;;  %v262_v39 = vpop.f32.mrf.mxu1 }
  0xe7   :  { %v233_v40 = vadd.f32 %v637_v12, %v232_v38  ;;  %v263_v41 = vadd.f32 %v637_v12, %v262_v39 }
  0xe8   :  { %359 = vst.msk [vmem:[%s882_s3 + $0x110] sm:$0xff] %vm123_vm0, %v291_v36 }
  0xe9   :  { %371 = vst.msk [vmem:[%s882_s3 + $0x170] sm:$0xff] %vm123_vm0, %v321_v37 }
  0xea   :  { %336 = vst.msk [vmem:[%s882_s3 + $0x58] sm:$0xff] %vm123_vm0, %v233_v40 }
  0xeb   :  { %348 = vst.msk [vmem:[%s882_s3 + $0xb8] sm:$0xff] %vm123_vm0, %v263_v41 }
  0xed   :  { %v292_v42 = vpop.f32.mrf.mxu2  ;;  %v322_v43 = vpop.f32.mrf.mxu3 }
  0xee   :  { %v293_v44 = vadd.f32 %v637_v12, %v292_v42  ;;  %v323_v45 = vadd.f32 %v637_v12, %v322_v43 }
  0xf0   :  { %360 = vst.msk [vmem:[%s882_s3 + $0x118] sm:$0xff] %vm123_vm0, %v293_v44 }
  0xf1   :  { %372 = vst.msk [vmem:[%s882_s3 + $0x178] sm:$0xff] %vm123_vm0, %v323_v45 }

</bundles_post_ra>
